<compile_context>
chip_gen: v5e
topology: v5e:2x2
jax: 0.10.0
libtpu: 0.0.40
codegen_flags: <defaults>
</compile_context>

<pallas_src>
import jax
import jax.numpy as jnp
from jax.experimental import pallas as pl
from jax.experimental.pallas import tpu as pltpu


def _round_up(n, m):
    return ((n + m - 1) // m) * m


def _mlp_kernel(x_ref,
                w1_ref, b1_ref,
                w2_ref, b2_ref,
                w3_ref, b3_ref,
                w4_ref, b4_ref,
                o_ref):
    # Cast inside the kernel: x arrives as raw f32, only ever read once from HBM.
    h = x_ref[...].astype(jnp.bfloat16)

    h = jnp.dot(h, w1_ref[...], preferred_element_type=jnp.float32) + b1_ref[...]
    h = jnp.maximum(h, 0.0).astype(jnp.bfloat16)

    h = jnp.dot(h, w2_ref[...], preferred_element_type=jnp.float32) + b2_ref[...]
    h = jnp.maximum(h, 0.0).astype(jnp.bfloat16)

    h = jnp.dot(h, w3_ref[...], preferred_element_type=jnp.float32) + b3_ref[...]
    h = jnp.maximum(h, 0.0).astype(jnp.bfloat16)

    h = jnp.dot(h, w4_ref[...], preferred_element_type=jnp.float32) + b4_ref[...]
    o_ref[...] = h.astype(o_ref.dtype)


def _choose_tm(B, cap):
    """Batch tile: full-dim block for tiny B, else >=2 grid steps (v7x megacore),
    tile a multiple of 8 and <= cap."""
    if B <= 16:
        return B                      # block == full dim -> always legal
    return min(cap, _round_up(pl.cdiv(B, 2), 8))


def advanced_nn_forward(x, params, *, tm_cap=1024):
    """x: [B, input_dim] float32.  params: list of (w[in,out] bf16, b[1,out] f32)."""
    (w1, b1), (w2, b2), (w3, b3), (w4, b4) = params
    B, din = x.shape
    out_dim = w4.shape[1]

    TM = _choose_tm(B, tm_cap)
    grid = (pl.cdiv(B, TM),)          # partial last block handled (masked) by Pallas

    def resident(arr):
        # Constant block index -> operand stays VMEM-resident across grid steps.
        return pl.BlockSpec(arr.shape, lambda i: (0, 0))

    out = pl.pallas_call(
        _mlp_kernel,
        out_shape=jax.ShapeDtypeStruct((B, out_dim), jnp.float32),
        grid=grid,
        in_specs=[pl.BlockSpec((TM, din), lambda i: (i, 0))]
                 + [resident(a) for a in (w1, b1, w2, b2, w3, b3, w4, b4)],
        out_specs=pl.BlockSpec((TM, out_dim), lambda i: (i, 0)),
        compiler_params=pltpu.CompilerParams(
            dimension_semantics=("parallel",),
            vmem_limit_bytes=32 * 1024 * 1024,
        ),
    )(x, w1, b1, w2, b2, w3, b3, w4, b4)
    return out


def init_raw_params(key, input_dim=50):
    """f32 params mimicking torch.nn.Linear default init, stored as [in, out]."""
    dims = [input_dim, 256, 128, 64, 2]
    params = []
    for i in range(4):
        fan_in, fan_out = dims[i], dims[i + 1]
        key, kw, kb = jax.random.split(key, 3)
        bound = 1.0 / jnp.sqrt(jnp.float32(fan_in))
        w = jax.random.uniform(kw, (fan_in, fan_out), jnp.float32, -bound, bound)
        b = jax.random.uniform(kb, (fan_out,), jnp.float32, -bound, bound)
        params.append((w, b))
    return params


def cast_params(raw_params):
    """Weights -> bf16 [in, out]; biases -> f32 [1, out]. No zero padding."""
    return [(w.astype(jnp.bfloat16), b.reshape(1, -1)) for w, b in raw_params]


def reference_forward_f32(x, raw_params):
    h = x
    for i, (w, b) in enumerate(raw_params):
        h = h @ w + b
        if i < 3:
            h = jnp.maximum(h, 0.0)
    return h


def reference_forward_bf16(x, params):
    """Same bf16-operand / f32-accumulate math as the kernel, in plain JAX."""
    h = x.astype(jnp.bfloat16)
    for i, (w, b) in enumerate(params):
        h = jnp.dot(h, w, preferred_element_type=jnp.float32) + b
        if i < 3:
            h = jnp.maximum(h, 0.0).astype(jnp.bfloat16)
    return h


if __name__ == "__main__":
    key = jax.random.PRNGKey(0)
    key, kx = jax.random.split(key)

    input_dim = 50
    batch = 8
    x = jax.random.normal(kx, (batch, input_dim), jnp.float32)

    raw_params = init_raw_params(key, input_dim=input_dim)
    params = cast_params(raw_params)

    # Single-block path (TM == B, grid=(1,)).
    out = jax.block_until_ready(advanced_nn_forward(x, params))
    assert out.shape == (batch, 2), out.shape

    ref_bf16 = reference_forward_bf16(x, params)
    assert jnp.allclose(out, ref_bf16, atol=5e-3, rtol=5e-3), "mismatch vs bf16 reference"

    ref_f32 = reference_forward_f32(x, raw_params)
    assert jnp.allclose(out, ref_f32, atol=5e-2, rtol=5e-2), "mismatch vs f32 reference"

    # Multi-step grid with a masked partial last block (no round-up of B to TM).
    key, kx2 = jax.random.split(key)
    x2 = jax.random.normal(kx2, (37, input_dim), jnp.float32)
    out2 = jax.block_until_ready(advanced_nn_forward(x2, params))
    assert out2.shape == (37, 2), out2.shape
    ref2 = reference_forward_bf16(x2, params)
    assert jnp.allclose(out2, ref2, atol=5e-3, rtol=5e-3), "mismatch on partial-block path"

    print("KERNEL_OK")
</pallas_src>

<mosaic_0001>
module attributes {stable_mosaic.version = 11 : i64} {
  func.func @_mlp_kernel(%arg0: i32, %arg1: memref<8x50xf32, #tpu.memory_space<vmem>>, %arg2: memref<50x256xbf16, #tpu.memory_space<vmem>>, %arg3: memref<1x256xf32, #tpu.memory_space<vmem>>, %arg4: memref<256x128xbf16, #tpu.memory_space<vmem>>, %arg5: memref<1x128xf32, #tpu.memory_space<vmem>>, %arg6: memref<128x64xbf16, #tpu.memory_space<vmem>>, %arg7: memref<1x64xf32, #tpu.memory_space<vmem>>, %arg8: memref<64x2xbf16, #tpu.memory_space<vmem>>, %arg9: memref<1x2xf32, #tpu.memory_space<vmem>>, %arg10: memref<8x2xf32, #tpu.memory_space<vmem>>) attributes {dimension_semantics = [#tpu.dimension_semantics<parallel>], iteration_bounds = array<i64: 1>, scalar_prefetch = 0 : i64, scratch_operands = 0 : i64, tpu.core_type = #tpu.core_type<tc>, window_params = [{transform_indices = @transform_0, window_bounds = array<i64: 8, 50>}, {pipeline_mode = #tpu.pipeline_mode<synchronous>, transform_indices = @transform_1, window_bounds = array<i64: 50, 256>}, {pipeline_mode = #tpu.pipeline_mode<synchronous>, transform_indices = @transform_2, window_bounds = array<i64: 1, 256>}, {pipeline_mode = #tpu.pipeline_mode<synchronous>, transform_indices = @transform_3, window_bounds = array<i64: 256, 128>}, {pipeline_mode = #tpu.pipeline_mode<synchronous>, transform_indices = @transform_4, window_bounds = array<i64: 1, 128>}, {pipeline_mode = #tpu.pipeline_mode<synchronous>, transform_indices = @transform_5, window_bounds = array<i64: 128, 64>}, {pipeline_mode = #tpu.pipeline_mode<synchronous>, transform_indices = @transform_6, window_bounds = array<i64: 1, 64>}, {pipeline_mode = #tpu.pipeline_mode<synchronous>, transform_indices = @transform_7, window_bounds = array<i64: 64, 2>}, {pipeline_mode = #tpu.pipeline_mode<synchronous>, transform_indices = @transform_8, window_bounds = array<i64: 1, 2>}, {transform_indices = @transform_9, window_bounds = array<i64: 8, 2>}]} {
    %c0 = arith.constant 0 : index
    %c0_0 = arith.constant 0 : index
    %0 = vector.load %arg1[%c0, %c0_0] : memref<8x50xf32, #tpu.memory_space<vmem>>, vector<8x50xf32>
    %1 = arith.truncf %0 : vector<8x50xf32> to vector<8x50xbf16>
    %c0_1 = arith.constant 0 : index
    %c0_2 = arith.constant 0 : index
    %2 = vector.load %arg2[%c0_1, %c0_2] : memref<50x256xbf16, #tpu.memory_space<vmem>>, vector<50x256xbf16>
    %cst = arith.constant dense<0.000000e+00> : vector<8x256xf32>
    %3 = tpu.matmul %1, %2, %cst {dimension_numbers = #tpu.dot_dimension_numbers<[1], [0], [0], [1], [0, 0, 1, 1], [], []>} : vector<8x50xbf16>, vector<50x256xbf16>, vector<8x256xf32> -> vector<8x256xf32>
    %c0_3 = arith.constant 0 : index
    %c0_4 = arith.constant 0 : index
    %4 = vector.load %arg3[%c0_3, %c0_4] : memref<1x256xf32, #tpu.memory_space<vmem>>, vector<1x256xf32>
    %5 = vector.broadcast %4 : vector<1x256xf32> to vector<8x256xf32>
    %6 = arith.addf %3, %5 : vector<8x256xf32>
    %cst_5 = arith.constant 0.000000e+00 : f32
    %7 = vector.broadcast %cst_5 : f32 to vector<8x256xf32>
    %8 = arith.maximumf %6, %7 : vector<8x256xf32>
    %9 = arith.truncf %8 : vector<8x256xf32> to vector<8x256xbf16>
    %c0_6 = arith.constant 0 : index
    %c0_7 = arith.constant 0 : index
    %10 = vector.load %arg4[%c0_6, %c0_7] : memref<256x128xbf16, #tpu.memory_space<vmem>>, vector<256x128xbf16>
    %cst_8 = arith.constant dense<0.000000e+00> : vector<8x128xf32>
    %11 = tpu.matmul %9, %10, %cst_8 {dimension_numbers = #tpu.dot_dimension_numbers<[1], [0], [0], [1], [0, 0, 1, 1], [], []>} : vector<8x256xbf16>, vector<256x128xbf16>, vector<8x128xf32> -> vector<8x128xf32>
    %c0_9 = arith.constant 0 : index
    %c0_10 = arith.constant 0 : index
    %12 = vector.load %arg5[%c0_9, %c0_10] : memref<1x128xf32, #tpu.memory_space<vmem>>, vector<1x128xf32>
    %13 = vector.broadcast %12 : vector<1x128xf32> to vector<8x128xf32>
    %14 = arith.addf %11, %13 : vector<8x128xf32>
    %cst_11 = arith.constant 0.000000e+00 : f32
    %15 = vector.broadcast %cst_11 : f32 to vector<8x128xf32>
    %16 = arith.maximumf %14, %15 : vector<8x128xf32>
    %17 = arith.truncf %16 : vector<8x128xf32> to vector<8x128xbf16>
    %c0_12 = arith.constant 0 : index
    %c0_13 = arith.constant 0 : index
    %18 = vector.load %arg6[%c0_12, %c0_13] : memref<128x64xbf16, #tpu.memory_space<vmem>>, vector<128x64xbf16>
    %cst_14 = arith.constant dense<0.000000e+00> : vector<8x64xf32>
    %19 = tpu.matmul %17, %18, %cst_14 {dimension_numbers = #tpu.dot_dimension_numbers<[1], [0], [0], [1], [0, 0, 1, 1], [], []>} : vector<8x128xbf16>, vector<128x64xbf16>, vector<8x64xf32> -> vector<8x64xf32>
    %c0_15 = arith.constant 0 : index
    %c0_16 = arith.constant 0 : index
    %20 = vector.load %arg7[%c0_15, %c0_16] : memref<1x64xf32, #tpu.memory_space<vmem>>, vector<1x64xf32>
    %21 = vector.broadcast %20 : vector<1x64xf32> to vector<8x64xf32>
    %22 = arith.addf %19, %21 : vector<8x64xf32>
    %cst_17 = arith.constant 0.000000e+00 : f32
    %23 = vector.broadcast %cst_17 : f32 to vector<8x64xf32>
    %24 = arith.maximumf %22, %23 : vector<8x64xf32>
    %25 = arith.truncf %24 : vector<8x64xf32> to vector<8x64xbf16>
    %c0_18 = arith.constant 0 : index
    %c0_19 = arith.constant 0 : index
    %26 = vector.load %arg8[%c0_18, %c0_19] : memref<64x2xbf16, #tpu.memory_space<vmem>>, vector<64x2xbf16>
    %cst_20 = arith.constant dense<0.000000e+00> : vector<8x2xf32>
    %27 = tpu.matmul %25, %26, %cst_20 {dimension_numbers = #tpu.dot_dimension_numbers<[1], [0], [0], [1], [0, 0, 1, 1], [], []>} : vector<8x64xbf16>, vector<64x2xbf16>, vector<8x2xf32> -> vector<8x2xf32>
    %c0_21 = arith.constant 0 : index
    %c0_22 = arith.constant 0 : index
    %28 = vector.load %arg9[%c0_21, %c0_22] : memref<1x2xf32, #tpu.memory_space<vmem>>, vector<1x2xf32>
    %29 = vector.broadcast %28 : vector<1x2xf32> to vector<8x2xf32>
    %30 = arith.addf %27, %29 : vector<8x2xf32>
    %c0_23 = arith.constant 0 : index
    %c0_24 = arith.constant 0 : index
    %31 = vector.load %arg10[%c0_23, %c0_24] : memref<8x2xf32, #tpu.memory_space<vmem>>, vector<8x2xf32>
    tpu.vector_store %arg10[%c0_23, %c0_24], %30 {strides = array<i32>} : memref<8x2xf32, #tpu.memory_space<vmem>>, vector<8x2xf32>,
    return
  }
  func.func @transform_0(%arg0: i32) -> (i32, i32) {
    %c0_i32 = arith.constant 0 : i32
    %c0_i32_0 = arith.constant 0 : i32
    return %arg0, %c0_i32 : i32, i32
  }
  func.func @transform_1(%arg0: i32) -> (i32, i32) {
    %c0_i32 = arith.constant 0 : i32
    %c0_i32_0 = arith.constant 0 : i32
    %c0_i32_1 = arith.constant 0 : i32
    return %c0_i32, %c0_i32_0 : i32, i32
  }
  func.func @transform_2(%arg0: i32) -> (i32, i32) {
    %c0_i32 = arith.constant 0 : i32
    %c0_i32_0 = arith.constant 0 : i32
    %c0_i32_1 = arith.constant 0 : i32
    return %c0_i32, %c0_i32_0 : i32, i32
  }
  func.func @transform_3(%arg0: i32) -> (i32, i32) {
    %c0_i32 = arith.constant 0 : i32
    %c0_i32_0 = arith.constant 0 : i32
    %c0_i32_1 = arith.constant 0 : i32
    return %c0_i32, %c0_i32_0 : i32, i32
  }
  func.func @transform_4(%arg0: i32) -> (i32, i32) {
    %c0_i32 = arith.constant 0 : i32
    %c0_i32_0 = arith.constant 0 : i32
    %c0_i32_1 = arith.constant 0 : i32
    return %c0_i32, %c0_i32_0 : i32, i32
  }
  func.func @transform_5(%arg0: i32) -> (i32, i32) {
    %c0_i32 = arith.constant 0 : i32
    %c0_i32_0 = arith.constant 0 : i32
    %c0_i32_1 = arith.constant 0 : i32
    return %c0_i32, %c0_i32_0 : i32, i32
  }
  func.func @transform_6(%arg0: i32) -> (i32, i32) {
    %c0_i32 = arith.constant 0 : i32
    %c0_i32_0 = arith.constant 0 : i32
    %c0_i32_1 = arith.constant 0 : i32
    return %c0_i32, %c0_i32_0 : i32, i32
  }
  func.func @transform_7(%arg0: i32) -> (i32, i32) {
    %c0_i32 = arith.constant 0 : i32
    %c0_i32_0 = arith.constant 0 : i32
    %c0_i32_1 = arith.constant 0 : i32
    return %c0_i32, %c0_i32_0 : i32, i32
  }
  func.func @transform_8(%arg0: i32) -> (i32, i32) {
    %c0_i32 = arith.constant 0 : i32
    %c0_i32_0 = arith.constant 0 : i32
    %c0_i32_1 = arith.constant 0 : i32
    return %c0_i32, %c0_i32_0 : i32, i32
  }
  func.func @transform_9(%arg0: i32) -> (i32, i32) {
    %c0_i32 = arith.constant 0 : i32
    %c0_i32_0 = arith.constant 0 : i32
    return %arg0, %c0_i32 : i32, i32
  }
}

</mosaic_0001>

<bundles_post_ra>
// kernel: tpu_custom_call.1
= control target key start
LH: loop header
LB: loop body
LE: loop exit
PB: predicated region body
PF: predicated region fallthrough
CT: control target
= control target key end

     0   :  { %14 = vsyncpa [#allocation3], 0  ;;  %s648_s12 = smov [#allocation2]   ;;  %s649_s14 = smov 64   ;;  %s797_s0 = inlined_call_operand.vmem [shape: f32[8,50], index: 0, kind: input, shape index: {}]   ;;  %s798_s1 = inlined_call_operand.vmem [shape: bf16[50,256], index: 1, kind: input, shape index: {}]   ;;  %s799_s2 = inlined_call_operand.vmem [shape: f32[1,256], index: 2, kind: input, shape index: {}]   ;;  %s800_s3 = inlined_call_operand.hbm [shape: bf16[256,128], index: 3, kind: input, shape index: {}]   ;;  %s801_s4 = inlined_call_operand.vmem [shape: f32[1,128], index: 4, kind: input, shape index: {}]   ;;  %s802_s5 = inlined_call_operand.vmem [shape: bf16[128,64], index: 5, kind: input, shape index: {}]   ;;  %s803_s6 = inlined_call_operand.vmem [shape: f32[1,64], index: 6, kind: input, shape index: {}]   ;;  %s804_s7 = inlined_call_operand.vmem [shape: bf16[64,2], index: 7, kind: input, shape index: {}]   ;;  %s805_s8 = inlined_call_operand.vmem [shape: f32[1,2], index: 8, kind: input, shape index: {}]   ;;  %s806_s9 = inlined_call_operand.vmem [shape: f32[8,2], index: 9, kind: output, shape index: {}]  }
   0x1   :  { %s25_s11 = sshll.u32 %s800_s3, 4  ;;  %s27_s13 = sshll.u32 %s648_s12, 4  ;;  %s26_s11 = int_to_ptr.hbm [resolvable:$true] %s25_s11  ;;  %s28_s13 = int_to_ptr.vmem [resolvable:$true] %s27_s13 }
   0x2   :  { %s650_s15 = smov 4  }
   0x3   :  { %33 = dma.hbm_to_vmem [thread:$0]  %s26_s11, 2048, %s28_s13, [#allocation3], %s649_s14, %s649_s14, %s650_s15  }
   0x4   :  { %646 = dma.done.wait [#allocation3], 2048  }
   0x5   :  { %647 = vsyncadd [#allocation3], 4294965248  ;;  %v57_v0 = vld [vmem:[%s798_s1 + $0x30] sm:$0x11]  ;;  %vm103_vm0 = vcmask 1040384   ;;  %v595_v9 = vld [vmem:[#allocation2 + $0x38] sm:$0xff] }
   0x6   :  { %v83_v1 = vunpack.c.l.b16 %v57_v0  ;;  %v84_v2 = vunpack.c.h.b16 %v57_v0  ;;  %v461_v3 = vld [vmem:[%s798_s1 + $0x20] sm:$0xf]  ;;  %v587_v6 = vld [vmem:[%s798_s1 + $0x24] sm:$0xf0]  ;;  %v586_v7 = vld [vmem:[%s798_s1 + $0x24] sm:$0xf]  ;;  %272 = vmatpush.bf16.msra.mxu2 %v595_v9 }
   0x7   :  { %v463_v8 = vld [vmem:[%s798_s1 + $0x28] sm:$0xf0]  ;;  %v603_v12 = vld [vmem:[#allocation2 + $0x78] sm:$0xff]  ;;  %v462_v13 = vor.u32 %v587_v6, %v461_v3  ;;  %v453_v15 = vld [vmem:[%s798_s1 + $0x10] sm:$0xf]  ;;  %vm99_vm1 = vcmask 408576  }
   0x8   :  { %v91_v4 = vpack.c.b16 %v83_v1, %v83_v1  ;;  %v92_v5 = vpack.c.b16 %v84_v2, %v84_v2  ;;  %v466_v14 = vor.u32 %v586_v7, %v463_v8  ;;  %v585_v16 = vld [vmem:[%s798_s1 + $0x14] sm:$0xf0]  ;;  %v584_v17 = vld [vmem:[%s798_s1 + $0x14] sm:$0xf]  ;;  %v455_v18 = vld [vmem:[%s798_s1 + $0x18] sm:$0xf0]  ;;  %285 = vmatpush.bf16.msra.mxu3 %v603_v12 }
   0x9   :  { %v594_v19 = vld [vmem:[#allocation2 + $0x30] sm:$0xff]  ;;  %v445_v21 = vld [vmem:[%s798_s1] sm:$0xf]  ;;  %v454_v22 = vor.u32 %v585_v16, %v453_v15  ;;  %v458_v23 = vor.u32 %v584_v17, %v455_v18  ;;  %v583_v24 = vld [vmem:[%s798_s1 + $0x4] sm:$0xf0]  ;;  %vm419_vm2 = vcmask 523264  }
   0xa   :  { %v105_v10 = vsel %vm103_vm0, %v91_v4, 0  ;;  %v108_v11 = vsel %vm103_vm0, %v92_v5, 0  ;;  %v602_v20 = vld [vmem:[#allocation2 + $0x70] sm:$0xff]  ;;  %v582_v25 = vld [vmem:[%s798_s1 + $0x4] sm:$0xf]  ;;  %273 = vmatpush.bf16.msra.mxu2 %v594_v19  ;;  %v593_v27 = vld [vmem:[#allocation2 + $0x28] sm:$0xff]  ;;  %v446_v29 = vor.u32 %v583_v24, %v445_v21 }
   0xb   :  { %114 = vmatpush.bf16.msra.mxu0 %v105_v10  ;;  %127 = vmatpush.bf16.msra.mxu1 %v108_v11  ;;  %v447_v26 = vld [vmem:[%s798_s1 + $0x8] sm:$0xf0]  ;;  %v49_v31 = vld [vmem:[%s797_s0] sm:$0xff]  ;;  %v591_v35 = vld [vmem:[#allocation2 + $0x18] sm:$0xff]  ;;  %vm436_vm3 = vcmask 15360  }
   0xc   :  { %286 = vmatpush.bf16.msra.mxu3 %v602_v20  ;;  %v601_v28 = vld [vmem:[#allocation2 + $0x68] sm:$0xff]  ;;  %v450_v30 = vor.u32 %v582_v25, %v447_v26  ;;  %v592_v32 = vld [vmem:[#allocation2 + $0x20] sm:$0xff]  ;;  %v50_v34 = vpack.c.bf16 %v49_v31, %v49_v31  ;;  %v599_v36 = vld [vmem:[#allocation2 + $0x58] sm:$0xff] }
   0xd   :  { %v600_v33 = vld [vmem:[#allocation2 + $0x60] sm:$0xff]  ;;  %v590_v37 = vld [vmem:[#allocation2 + $0x10] sm:$0xff]  ;;  %v589_v39 = vld [vmem:[#allocation2 + $0x8] sm:$0xff] }
   0xe   :  { %274 = vmatpush.bf16.msra.mxu2 %v593_v27  ;;  %v598_v38 = vld [vmem:[#allocation2 + $0x50] sm:$0xff]  ;;  %v597_v40 = vld [vmem:[#allocation2 + $0x48] sm:$0xff]  ;;  %v588_v41 = vld [vmem:[#allocation2] sm:$0xff] }
   0xf   :  { %115 = vmatpush.bf16.msra.mxu0 %v462_v13  ;;  %128 = vmatpush.bf16.msra.mxu1 %v466_v14  ;;  %v596_v42 = vld [vmem:[#allocation2 + $0x40] sm:$0xff]  ;;  %v611_v43 = vld [vmem:[%s802_s5 + $0x38] sm:$0xff]  ;;  %v610_v44 = vld [vmem:[%s802_s5 + $0x30] sm:$0xff] }
  0x10   :  { %287 = vmatpush.bf16.msra.mxu3 %v601_v28  ;;  %v609_v45 = vld [vmem:[%s802_s5 + $0x28] sm:$0xff]  ;;  %v608_v46 = vld [vmem:[%s802_s5 + $0x20] sm:$0xff]  ;;  %v607_v47 = vld [vmem:[%s802_s5 + $0x18] sm:$0xff] }
  0x11   :  { %v58_v48 = vld [vmem:[%s799_s2] sm:$0x3]  ;;  %v606_v49 = vld [vmem:[%s802_s5 + $0x10] sm:$0xff]  ;;  %v605_v62 = vld [vmem:[%s802_s5 + $0x8] sm:$0xff] }
  0x12   :  { %275 = vmatpush.bf16.msra.mxu2 %v592_v32  ;;  %v60_v50 = vperm.slane %v58_v48, 0  ;;  %v61_v51 = vperm.slane %v58_v48, 1  ;;  %v604_v63 = vld [vmem:[%s802_s5] sm:$0xff]  ;;  %v615_v0 = vld [vmem:[%s804_s7 + $0x18] sm:$0xff]  ;;  %v614_v1 = vld [vmem:[%s804_s7 + $0x10] sm:$0xff] }
  0x13   :  { %116 = vmatpush.bf16.msra.mxu0 %v454_v22  ;;  %129 = vmatpush.bf16.msra.mxu1 %v458_v23  ;;  %v613_v2 = vld [vmem:[%s804_s7 + $0x8] sm:$0xff]  ;;  %v619_v3 = vld [vmem:[%s801_s4] ss:$0 sm:$0xff] }
  0x14   :  { %288 = vmatpush.bf16.msra.mxu3 %v600_v33  ;;  %v612_v12 = vld [vmem:[%s804_s7] sm:$0xff] }
  0x15   :  { %v620_v13 = vld [vmem:[%s803_s6] ss:$0 sm:$0xff] }
  0x16   :  { %276 = vmatpush.bf16.msra.mxu2 %v591_v35  ;;  %v621_v19 = vld [vmem:[%s805_s8] ss:$0 sm:$0xff] }
  0x17   :  { %117 = vmatpush.bf16.msra.mxu0 %v446_v29  ;;  %130 = vmatpush.bf16.msra.mxu1 %v450_v30 }
  0x18   :  { %289 = vmatpush.bf16.msra.mxu3 %v599_v36 }
  0x1a   :  { %467 = vmatmul.msk.bf16.vlgmr.msra.gmra.mxu0 %vm99_vm1, %v50_v34  ;;  %468 = vmatmul.msk.bf16.vlgmr.msra.gmra.mxu1 %vm99_vm1, %v50_v34 }
  0x1b   :  { %277 = vmatpush.bf16.msra.mxu2 %v590_v37  ;;  %368 = vmatpush.bf16.msrb.mxu0 %v611_v43 }
  0x1c   :  { %290 = vmatpush.bf16.msra.mxu3 %v598_v38  ;;  %427 = vmatpush.bf16.msrb.mxu1 %v615_v0 }
  0x1f   :  { %278 = vmatpush.bf16.msra.mxu2 %v589_v39  ;;  %369 = vmatpush.bf16.msrb.mxu0 %v610_v44 }
  0x20   :  { %291 = vmatpush.bf16.msra.mxu3 %v597_v40  ;;  %428 = vmatpush.bf16.msrb.mxu1 %v614_v1 }
  0x23   :  { %279 = vmatpush.bf16.msra.mxu2 %v588_v41  ;;  %370 = vmatpush.bf16.msrb.mxu0 %v609_v45 }
  0x24   :  { %292 = vmatpush.bf16.msra.mxu3 %v596_v42  ;;  %429 = vmatpush.bf16.msrb.mxu1 %v613_v2 }
  0x27   :  { %371 = vmatpush.bf16.msrb.mxu0 %v608_v46 }
  0x28   :  { %430 = vmatpush.bf16.msrb.mxu1 %v612_v12 }
  0x2b   :  { %372 = vmatpush.bf16.msrb.mxu0 %v607_v47 }
  0x2f   :  { %373 = vmatpush.bf16.msrb.mxu0 %v606_v49 }
  0x33   :  { %374 = vmatpush.bf16.msrb.mxu0 %v605_v62 }
  0x37   :  { %375 = vmatpush.bf16.msrb.mxu0 %v604_v63 }
  0x97   :  { %v119_v52 = vpop.f32.mrf.mxu0  ;;  %v132_v53 = vpop.f32.mrf.mxu1 }
  0x98   :  { %v120_v54 = vadd.f32 %v119_v52, %v60_v50  ;;  %v133_v55 = vadd.f32 %v132_v53, %v61_v51 }
  0x9a   :  { %v136_v56 = vmax.f32 %v120_v54, 0.0  ;;  %v137_v57 = vmax.f32 %v133_v55, 0.0 }
  0x9c   :  { %v138_v58 = vpack.c.bf16 %v136_v56, %v136_v56  ;;  %v139_v59 = vpack.c.bf16 %v137_v57, %v137_v57 }
  0x9e   :  { %280 = vmatmul.bf16.vlgmr.msra.gmra.mxu2 %v138_v58  ;;  %293 = vmatmul.bf16.vlgmr.msra.gmra.mxu3 %v139_v59 }
  0x9f   :  { %v121_v60 = vpop.f32.mrf.mxu0  ;;  %v134_v61 = vpop.f32.mrf.mxu1 }
 0x121   :  { %v281_v4 = vpop.f32.mrf.mxu2  ;;  %v294_v5 = vpop.f32.mrf.mxu3 }
 0x122   :  { %v282_v6 = vadd.f32 %v619_v3, %v281_v4 }
 0x124   :  { %v295_v7 = vadd.f32 %v294_v5, %v282_v6 }
 0x126   :  { %v298_v8 = vmax.f32 %v295_v7, 0.0 }
 0x128   :  { %v299_v9 = vpack.c.bf16 %v298_v8, %v298_v8 }
 0x129   :  { %v283_v10 = vpop.f32.mrf.mxu2  ;;  %v296_v11 = vpop.f32.mrf.mxu3 }
 0x12a   :  { %376 = vmatmul.bf16.vlgmr.msrb.gmra.mxu0 %v299_v9 }
 0x1a7   :  { %v377_v14 = vpop.f32.mrf.mxu0 }
 0x1a8   :  { %v378_v15 = vadd.f32 %v620_v13, %v377_v14 }
 0x1aa   :  { %v381_v16 = vmax.f32 %v378_v15, 0.0 }
 0x1ac   :  { %v382_v17 = vpack.c.bf16 %v381_v16, %v381_v16 }
 0x1ae   :  { %581 = vmatmul.msk.bf16.vlgmr.msrb.gmra.mxu1 %vm419_vm2, %v382_v17 }
 0x1af   :  { %v379_v18 = vpop.f32.mrf.mxu0 }
 0x22b   :  { %v432_v20 = vpop.f32.mrf.mxu1 }
 0x22c   :  { %v433_v21 = vadd.f32 %v621_v19, %v432_v20 }
 0x22e   :  { %437 = vst.msk [vmem:[%s806_s9] sm:$0xff] %vm436_vm3, %v433_v21 }
 0x233   :  { %v434_v22 = vpop.f32.mrf.mxu1 }
 0x234   :  { %442 = vsyncpa [#allocation3], 1 }

</bundles_post_ra>
